<compile_context>
chip_gen: v5e
topology: v5e:2x2
jax: 0.10.0
libtpu: 0.0.40
codegen_flags: <defaults>
</compile_context>

<pallas_src>
import jax
import jax.numpy as jnp
from jax import lax
from jax.experimental import pallas as pl
from jax.experimental.pallas import tpu as pltpu

_LANES = 128
_SUBLANES = 8


def _cdiv(a, b):
    return -(-a // b)


def _round_up(a, b):
    return _cdiv(a, b) * b


def _make_pit_kernel(tile_rows, chunk_rows, tiles_per_shard, rows_valid, needs_mask):
    """Build the per-tile streaming PIT-MSE reduction kernel (all args static)."""
    n_chunks = tile_rows // chunk_rows
    unroll = min(n_chunks, 8)

    def kernel(s1p_ref, s2p_ref, s1_ref, s2_ref, acc1_ref, acc2_ref):
        # Init the per-shard accumulators at the first tile of each shard.
        @pl.when(pl.program_id(1) == 0)
        def _init():
            acc1_ref[...] = jnp.zeros_like(acc1_ref)
            acc2_ref[...] = jnp.zeros_like(acc2_ref)

        # Unclamped global row offset of this grid step.  Only used for the
        # tail / duplicate-step mask; the DMA index itself is clamped in the
        # index_map so reads always start inside the array.
        tile_row0 = (pl.program_id(0) * tiles_per_shard + pl.program_id(1)) * tile_rows

        def chunk_body(c, carry):
            a1, a2 = carry
            r = pl.multiple_of(c * chunk_rows, chunk_rows)
            s1p = s1p_ref[pl.ds(r, chunk_rows), :].astype(jnp.float32)
            s2p = s2p_ref[pl.ds(r, chunk_rows), :].astype(jnp.float32)
            s1 = s1_ref[pl.ds(r, chunk_rows), :].astype(jnp.float32)
            s2 = s2_ref[pl.ds(r, chunk_rows), :].astype(jnp.float32)
            d11 = s1p - s1
            d22 = s2p - s2
            d12 = s1p - s2
            d21 = s2p - s1
            p1 = d11 * d11 + d22 * d22   # permutation (s1_pred->s1, s2_pred->s2)
            p2 = d12 * d12 + d21 * d21   # permutation (s1_pred->s2, s2_pred->s1)
            if needs_mask:
                # Mask rows past the valid slab (stale-VMEM garbage in a
                # partial last block, or a clamped duplicate step).  where()
                # selects 0 even if the garbage produced NaN/Inf.
                row_ids = (tile_row0 + r
                           + lax.broadcasted_iota(jnp.int32, (chunk_rows, 1), 0))
                valid = row_ids < rows_valid
                p1 = jnp.where(valid, p1, 0.0)
                p2 = jnp.where(valid, p2, 0.0)
            # (chunk,128) -> (chunk//8, 8, 128); summing the leading axis is
            # pure per-lane VPU adds.  The single cross-lane reduce happens
            # once, in the JAX epilogue, so the hot loop keeps the XLU idle
            # and stays HBM-bandwidth-bound.
            p1 = p1.reshape(chunk_rows // _SUBLANES, _SUBLANES, _LANES).sum(axis=0)
            p2 = p2.reshape(chunk_rows // _SUBLANES, _SUBLANES, _LANES).sum(axis=0)
            return a1 + p1, a2 + p2

        zero = jnp.zeros((_SUBLANES, _LANES), jnp.float32)
        a1, a2 = lax.fori_loop(0, n_chunks, chunk_body, (zero, zero), unroll=unroll)
        acc1_ref[...] += a1
        acc2_ref[...] += a2

    return kernel


def pit_base_ss_loss(s1_pred, s2_pred, s1, s2, *, num_shards=2, max_tile_rows=2048):
    """Pallas implementation of BaseSSLoss.forward with MSE as self.loss."""
    assert s1_pred.shape == s2_pred.shape == s1.shape == s2.shape
    assert s1_pred.dtype == s2_pred.dtype == s1.dtype == s2.dtype
    dtype = s1_pred.dtype
    itemsize = jnp.dtype(dtype).itemsize
    total = int(s1_pred.size)                        # true element count B*T

    # Sublane packing granularity: f32 -> 8 rows, bf16 -> 16, int8/fp8 -> 32.
    row_align = _SUBLANES * max(1, 4 // itemsize)
    # Chunk of the in-kernel accumulation loop: 64 f32 / 128 bf16 rows keeps
    # the live working set to ~a dozen vregs regardless of tile size.
    chunk_rows = min(_SUBLANES * row_align,
                     _round_up(max(int(max_tile_rows), row_align), row_align))

    rows_data = _cdiv(max(total, 1), _LANES)         # rows holding real samples
    tile_cap = _round_up(max(int(max_tile_rows), chunk_rows), chunk_rows)
    tile_rows = min(tile_cap, _round_up(rows_data, chunk_rows))
    # Large inputs keep their natural row count (no rounding to tile
    # multiples -> no HBM pad copy when total % 128 == 0).  Sub-tile inputs
    # are padded up to one full tile so a block never exceeds the array; the
    # copy there is tiny by construction.
    slab_rows = max(rows_data, tile_rows)
    padded_total = slab_rows * _LANES

    num_tiles = _cdiv(slab_rows, tile_rows)
    num_shards_eff = max(1, min(int(num_shards), num_tiles))
    tiles_per_shard = _cdiv(num_tiles, num_shards_eff)

    partial_tail = num_tiles * tile_rows != slab_rows
    dup_steps = num_shards_eff * tiles_per_shard != num_tiles
    needs_mask = partial_tail or dup_steps

    def to_slab(x):
        flat = x.reshape(-1)                         # contiguous: free
        if padded_total != total:
            # Zero padding contributes 0 to both squared-error sums; the
            # final division uses the true count.  No pad op is emitted for
            # the common aligned case.
            flat = jnp.pad(flat, (0, padded_total - total))
        return flat.reshape(slab_rows, _LANES)       # lane-dense slab

    slabs = [to_slab(x) for x in (s1_pred, s2_pred, s1, s2)]

    last_block = num_tiles - 1
    if dup_steps:
        def data_index_map(s, t):
            # Duplicate steps of an uneven shard split re-read the last valid
            # tile; their contribution is masked out in-kernel.
            return jnp.minimum(s * tiles_per_shard + t, last_block), 0
    else:
        def data_index_map(s, t):
            return s * tiles_per_shard + t, 0

    total_steps = num_shards_eff * tiles_per_shard
    n_buf = 3 if (tile_rows <= 512 and total_steps >= 4) else 2
    in_spec = None
    if n_buf > 2 and hasattr(pl, "Buffered"):
        try:
            in_spec = pl.BlockSpec((tile_rows, _LANES), data_index_map,
                                   pipeline_mode=pl.Buffered(n_buf))
        except TypeError:          # older pallas without pipeline_mode
            in_spec = None
    if in_spec is None:
        n_buf = 2
        in_spec = pl.BlockSpec((tile_rows, _LANES), data_index_map)

    # Per-shard (8,128) partial-sum block; same block across the reduction
    # axis -> VMEM-resident, one HBM writeback per shard.
    out_spec = pl.BlockSpec((_SUBLANES, _LANES), lambda s, t: (s, 0))
    out_shape = jax.ShapeDtypeStruct((num_shards_eff * _SUBLANES, _LANES), jnp.float32)

    # Explicit VMEM budget: 4 inputs x n_buf buffers x tile + accumulators,
    # with headroom for Mosaic scratch.  Fits every generation's default.
    tile_bytes = tile_rows * _LANES * itemsize
    footprint = 4 * n_buf * tile_bytes + 4 * 2 * _SUBLANES * _LANES * 4
    vmem_limit = min(64 * 1024 * 1024,
                     max(32 * 1024 * 1024, footprint * 3 // 2 + (1 << 20)))

    kernel = _make_pit_kernel(tile_rows, chunk_rows, tiles_per_shard,
                              rows_valid=slab_rows, needs_mask=needs_mask)

    acc1, acc2 = pl.pallas_call(
        kernel,
        grid=(num_shards_eff, tiles_per_shard),
        in_specs=[in_spec, in_spec, in_spec, in_spec],
        out_specs=(out_spec, out_spec),
        out_shape=(out_shape, out_shape),
        compiler_params=pltpu.CompilerParams(
            # shard axis -> megacore split on v7x; reduction axis arbitrary.
            dimension_semantics=("parallel", "arbitrary"),
            vmem_limit_bytes=vmem_limit,
        ),
        cost_estimate=pl.CostEstimate(
            flops=12 * padded_total,
            transcendentals=0,
            bytes_accessed=4 * padded_total * itemsize
            + 2 * num_shards_eff * _SUBLANES * _LANES * 4,
        ),
    )(*slabs)

    # Epilogue: tiny cross-shard / cross-lane combine in plain JAX.
    inv_2n = 0.5 / float(total)
    loss_perm_1 = jnp.sum(acc1) * inv_2n
    loss_perm_2 = jnp.sum(acc2) * inv_2n
    loss = jnp.minimum(loss_perm_1, loss_perm_2)
    return {"loss": loss}


def _reference(s1_pred, s2_pred, s1, s2):
    f = lambda x: x.astype(jnp.float32)
    mse = lambda a, b: jnp.mean((f(a) - f(b)) ** 2)
    p1 = (mse(s1_pred, s1) + mse(s2_pred, s2)) / 2
    p2 = (mse(s1_pred, s2) + mse(s2_pred, s1)) / 2
    return jnp.minimum(p1, p2)


def _run_case(key, B, T, dtype=jnp.float32, rtol=1e-5, atol=1e-6, **kwargs):
    k1, k2, k3, k4 = jax.random.split(key, 4)
    mk = lambda k: jax.random.normal(k, (B, T), dtype=jnp.float32).astype(dtype)
    s1_pred, s2_pred, s1, s2 = mk(k1), mk(k2), mk(k3), mk(k4)
    out = pit_base_ss_loss(s1_pred, s2_pred, s1, s2, **kwargs)
    loss = jax.block_until_ready(out["loss"])
    ref = jax.block_until_ready(_reference(s1_pred, s2_pred, s1, s2))
    assert jnp.allclose(loss, ref, rtol=rtol, atol=atol), (B, T, dtype, loss, ref)


if __name__ == "__main__":
    keys = jax.random.split(jax.random.PRNGKey(0), 7)
    # Primary small case (batch=2, 128 samples): single small tile.
    _run_case(keys[0], 2, 128)
    # Multi-tile streaming across both grid shards (forced small tiles,
    # exercises 3-deep input buffering).
    _run_case(keys[1], 2, 4096, max_tile_rows=8)
    # Ragged total (not a multiple of 128) -> lane-pad path.
    _run_case(keys[2], 3, 1000)
    # Odd tile count with 2 shards: clamped duplicate step + in-kernel mask.
    _run_case(keys[3], 2, 12288, max_tile_rows=64)
    # Partial final tile: in-kernel tail mask on a multi-tile grid.
    _run_case(keys[4], 2, 12288, max_tile_rows=128)
    # Realistic 1s@16kHz waveform (128-aligned total, zero-copy slab).
    _run_case(keys[5], 2, 16000)
    # Narrow input dtype stays narrow end-to-end (HBM traffic halved).
    _run_case(keys[6], 2, 4096, dtype=jnp.bfloat16, rtol=2e-2, atol=2e-2)
    print("KERNEL_OK")
</pallas_src>

<mosaic_0001>
module attributes {stable_mosaic.version = 11 : i64} {
  func.func @kernel(%arg0: i32, %arg1: i32, %arg2: memref<64x128xf32, #tpu.memory_space<vmem>>, %arg3: memref<64x128xf32, #tpu.memory_space<vmem>>, %arg4: memref<64x128xf32, #tpu.memory_space<vmem>>, %arg5: memref<64x128xf32, #tpu.memory_space<vmem>>, %arg6: memref<8x128xf32, #tpu.memory_space<vmem>>, %arg7: memref<8x128xf32, #tpu.memory_space<vmem>>) attributes {dimension_semantics = [#tpu.dimension_semantics<parallel>, #tpu.dimension_semantics<arbitrary>], iteration_bounds = array<i64: 1, 1>, scalar_prefetch = 0 : i64, scratch_operands = 0 : i64, tpu.core_type = #tpu.core_type<tc>, window_params = [{transform_indices = @transform_0, window_bounds = array<i64: 64, 128>}, {transform_indices = @transform_1, window_bounds = array<i64: 64, 128>}, {transform_indices = @transform_2, window_bounds = array<i64: 64, 128>}, {transform_indices = @transform_3, window_bounds = array<i64: 64, 128>}, {transform_indices = @transform_4, window_bounds = array<i64: 8, 128>}, {transform_indices = @transform_5, window_bounds = array<i64: 8, 128>}]} {
    %c0_i32 = arith.constant 0 : i32
    %0 = arith.cmpi eq, %arg1, %c0_i32 : i32
    %1 = arith.extui %0 : i1 to i32
    %c0_i32_0 = arith.constant 0 : i32
    %2 = arith.cmpi ne, %1, %c0_i32_0 : i32
    scf.if %2 {
      %cst_15 = arith.constant 0.000000e+00 : f32
      %36 = vector.broadcast %cst_15 : f32 to vector<8x128xf32>
      %c0_16 = arith.constant 0 : index
      %c0_17 = arith.constant 0 : index
      %37 = vector.load %arg6[%c0_16, %c0_17] : memref<8x128xf32, #tpu.memory_space<vmem>>, vector<8x128xf32>
      tpu.vector_store %arg6[%c0_16, %c0_17], %36 {strides = array<i32>} : memref<8x128xf32, #tpu.memory_space<vmem>>, vector<8x128xf32>,
      %cst_18 = arith.constant 0.000000e+00 : f32
      %38 = vector.broadcast %cst_18 : f32 to vector<8x128xf32>
      %c0_19 = arith.constant 0 : index
      %c0_20 = arith.constant 0 : index
      %39 = vector.load %arg7[%c0_19, %c0_20] : memref<8x128xf32, #tpu.memory_space<vmem>>, vector<8x128xf32>
      tpu.vector_store %arg7[%c0_19, %c0_20], %38 {strides = array<i32>} : memref<8x128xf32, #tpu.memory_space<vmem>>, vector<8x128xf32>,
    } else {
    }
    %cst = arith.constant 0.000000e+00 : f32
    %3 = vector.broadcast %cst : f32 to vector<8x128xf32>
    %c0_i32_1 = arith.constant 0 : i32
    %c64_i32 = arith.constant 64 : i32
    %4 = arith.muli %c0_i32_1, %c64_i32 : i32
    %5 = tpu.assume_multiple %4, 64 : i32
    %6 = arith.index_cast %5 : i32 to index
    %c0 = arith.constant 0 : index
    %7 = vector.load %arg2[%6, %c0] : memref<64x128xf32, #tpu.memory_space<vmem>>, vector<64x128xf32>
    %8 = arith.index_cast %5 : i32 to index
    %c0_2 = arith.constant 0 : index
    %9 = vector.load %arg3[%8, %c0_2] : memref<64x128xf32, #tpu.memory_space<vmem>>, vector<64x128xf32>
    %10 = arith.index_cast %5 : i32 to index
    %c0_3 = arith.constant 0 : index
    %11 = vector.load %arg4[%10, %c0_3] : memref<64x128xf32, #tpu.memory_space<vmem>>, vector<64x128xf32>
    %12 = arith.index_cast %5 : i32 to index
    %c0_4 = arith.constant 0 : index
    %13 = vector.load %arg5[%12, %c0_4] : memref<64x128xf32, #tpu.memory_space<vmem>>, vector<64x128xf32>
    %14 = arith.subf %7, %11 : vector<64x128xf32>
    %15 = arith.subf %9, %13 : vector<64x128xf32>
    %16 = arith.subf %7, %13 : vector<64x128xf32>
    %17 = arith.subf %9, %11 : vector<64x128xf32>
    %18 = arith.mulf %14, %14 : vector<64x128xf32>
    %19 = arith.mulf %15, %15 : vector<64x128xf32>
    %20 = arith.addf %18, %19 : vector<64x128xf32>
    %21 = arith.mulf %16, %16 : vector<64x128xf32>
    %22 = arith.mulf %17, %17 : vector<64x128xf32>
    %23 = arith.addf %21, %22 : vector<64x128xf32>
    %24 = vector.shape_cast %20 : vector<64x128xf32> to vector<8x8x128xf32>
    %cst_5 = arith.constant dense<0.000000e+00> : vector<8x128xf32>
    %25 = vector.multi_reduction <add>, %24, %cst_5 [0] : vector<8x8x128xf32> to vector<8x128xf32>
    %26 = vector.shape_cast %23 : vector<64x128xf32> to vector<8x8x128xf32>
    %cst_6 = arith.constant dense<0.000000e+00> : vector<8x128xf32>
    %27 = vector.multi_reduction <add>, %26, %cst_6 [0] : vector<8x8x128xf32> to vector<8x128xf32>
    %28 = arith.addf %3, %25 : vector<8x128xf32>
    %29 = arith.addf %3, %27 : vector<8x128xf32>
    %c1_i32 = arith.constant 1 : i32
    %c0_7 = arith.constant 0 : index
    %c0_8 = arith.constant 0 : index
    %30 = vector.load %arg6[%c0_7, %c0_8] : memref<8x128xf32, #tpu.memory_space<vmem>>, vector<8x128xf32>
    %31 = arith.addf %30, %28 : vector<8x128xf32>
    %c0_9 = arith.constant 0 : index
    %c0_10 = arith.constant 0 : index
    %32 = vector.load %arg6[%c0_9, %c0_10] : memref<8x128xf32, #tpu.memory_space<vmem>>, vector<8x128xf32>
    tpu.vector_store %arg6[%c0_9, %c0_10], %31 {strides = array<i32>} : memref<8x128xf32, #tpu.memory_space<vmem>>, vector<8x128xf32>,
    %c0_11 = arith.constant 0 : index
    %c0_12 = arith.constant 0 : index
    %33 = vector.load %arg7[%c0_11, %c0_12] : memref<8x128xf32, #tpu.memory_space<vmem>>, vector<8x128xf32>
    %34 = arith.addf %33, %29 : vector<8x128xf32>
    %c0_13 = arith.constant 0 : index
    %c0_14 = arith.constant 0 : index
    %35 = vector.load %arg7[%c0_13, %c0_14] : memref<8x128xf32, #tpu.memory_space<vmem>>, vector<8x128xf32>
    tpu.vector_store %arg7[%c0_13, %c0_14], %34 {strides = array<i32>} : memref<8x128xf32, #tpu.memory_space<vmem>>, vector<8x128xf32>,
    return
  }
  func.func @transform_0(%arg0: i32, %arg1: i32) -> (i32, i32) {
    %c1_i32 = arith.constant 1 : i32
    %0 = arith.muli %arg0, %c1_i32 : i32
    %1 = arith.addi %0, %arg1 : i32
    %c0_i32 = arith.constant 0 : i32
    %c0_i32_0 = arith.constant 0 : i32
    return %1, %c0_i32 : i32, i32
  }
  func.func @transform_1(%arg0: i32, %arg1: i32) -> (i32, i32) {
    %c1_i32 = arith.constant 1 : i32
    %0 = arith.muli %arg0, %c1_i32 : i32
    %1 = arith.addi %0, %arg1 : i32
    %c0_i32 = arith.constant 0 : i32
    %c0_i32_0 = arith.constant 0 : i32
    return %1, %c0_i32 : i32, i32
  }
  func.func @transform_2(%arg0: i32, %arg1: i32) -> (i32, i32) {
    %c1_i32 = arith.constant 1 : i32
    %0 = arith.muli %arg0, %c1_i32 : i32
    %1 = arith.addi %0, %arg1 : i32
    %c0_i32 = arith.constant 0 : i32
    %c0_i32_0 = arith.constant 0 : i32
    return %1, %c0_i32 : i32, i32
  }
  func.func @transform_3(%arg0: i32, %arg1: i32) -> (i32, i32) {
    %c1_i32 = arith.constant 1 : i32
    %0 = arith.muli %arg0, %c1_i32 : i32
    %1 = arith.addi %0, %arg1 : i32
    %c0_i32 = arith.constant 0 : i32
    %c0_i32_0 = arith.constant 0 : i32
    return %1, %c0_i32 : i32, i32
  }
  func.func @transform_4(%arg0: i32, %arg1: i32) -> (i32, i32) {
    %c0_i32 = arith.constant 0 : i32
    %c0_i32_0 = arith.constant 0 : i32
    return %arg0, %c0_i32 : i32, i32
  }
  func.func @transform_5(%arg0: i32, %arg1: i32) -> (i32, i32) {
    %c0_i32 = arith.constant 0 : i32
    %c0_i32_0 = arith.constant 0 : i32
    return %arg0, %c0_i32 : i32, i32
  }
}

</mosaic_0001>

<bundles_post_ra>
// kernel: tpu_custom_call.1
= control target key start
LH: loop header
LB: loop body
LE: loop exit
PB: predicated region body
PF: predicated region fallthrough
CT: control target
= control target key end

     0   :  { %11 = vsyncpa [#allocation3], 0  ;;  %s586_s0 = inlined_call_operand.hbm [shape: f32[64,128], index: 0, kind: input, shape index: {}]   ;;  %s587_s1 = inlined_call_operand.hbm [shape: f32[64,128], index: 1, kind: input, shape index: {}]   ;;  %s588_s2 = inlined_call_operand.hbm [shape: f32[64,128], index: 2, kind: input, shape index: {}]   ;;  %s589_s3 = inlined_call_operand.hbm [shape: f32[64,128], index: 3, kind: input, shape index: {}]   ;;  %s590_s4 = inlined_call_operand.hbm [shape: f32[8,128], index: 4, kind: output, shape index: {0}]   ;;  %s591_s5 = inlined_call_operand.hbm [shape: f32[8,128], index: 5, kind: output, shape index: {1}]  }
   0x1   :  { %12 = vsyncpa [#allocation6], 0 }
   0x2   :  { %13 = vsyncpa [#allocation9], 0 }
   0x3   :  { %14 = vsyncpa [#allocation4], 0 }
   0x4   :  { %15 = vsyncpa [#allocation12], 0  ;;  %s41_s20 = sshll.u32 %s587_s1, 4  ;;  %s446_s21 = smov [#allocation5]   ;;  %s42_s20 = int_to_ptr.hbm [resolvable:$true] %s41_s20 }
   0x5   :  { %s43_s22 = sshll.u32 %s446_s21, 4  ;;  %s24_s25 = sshll.u32 %s586_s0, 4  ;;  %s44_s22 = int_to_ptr.vmem [resolvable:$true] %s43_s22  ;;  %s25_s25 = int_to_ptr.hbm [resolvable:$true] %s24_s25 }
   0x6   :  { %s447_s26 = smov 128   ;;  %s448_s27 = smov 8  }
   0x7   :  { %49 = dma.hbm_to_vmem [thread:$0]  %s42_s20, 1024, %s44_s22, [#allocation6], %s447_s26, %s447_s26, %s448_s27  }
   0x8   :  { %s449_s28 = smov [#allocation2]   ;;  %s58_s7 = sshll.u32 %s588_s2, 4  ;;  %s59_s7 = int_to_ptr.hbm [resolvable:$true] %s58_s7 }
   0x9   :  { %s26_s29 = sshll.u32 %s449_s28, 4  ;;  %s75_s9 = sshll.u32 %s589_s3, 4  ;;  %s27_s29 = int_to_ptr.vmem [resolvable:$true] %s26_s29  ;;  %s76_s9 = int_to_ptr.hbm [resolvable:$true] %s75_s9 }
   0xa   :  { %32 = dma.hbm_to_vmem [thread:$0]  %s25_s25, 1024, %s27_s29, [#allocation3], %s447_s26, %s447_s26, %s448_s27  }
   0xb   :  { %s450_s10 = smov [#allocation7]   ;;  %s451_s0 = smov [#allocation8]  }
   0xc   :  { %s60_s11 = sshll.u32 %s450_s10, 4  ;;  %s77_s12 = sshll.u32 %s451_s0, 4  ;;  %s61_s11 = int_to_ptr.vmem [resolvable:$true] %s60_s11  ;;  %s78_s12 = int_to_ptr.vmem [resolvable:$true] %s77_s12 }
   0xd   :  { %66 = dma.hbm_to_vmem [thread:$0]  %s59_s7, 1024, %s61_s11, [#allocation6], %s447_s26, %s447_s26, %s448_s27  }
   0xe   :  { %83 = dma.hbm_to_vmem [thread:$0]  %s76_s9, 1024, %s78_s12, [#allocation9], %s447_s26, %s447_s26, %s448_s27  }
   0xf   :  { %436 = dma.done.wait [#allocation3], 1024  }
  0x10   :  { %437 = vsyncadd [#allocation3], 4294966272 }
  0x11   :  { %438 = dma.done.wait [#allocation6], 2048  }
  0x12   :  { %439 = vsyncadd [#allocation6], 4294965248 }
  0x13   :  { %440 = dma.done.wait [#allocation9], 1024  }
  0x14   :  { %441 = vsyncadd [#allocation9], 4294966272  ;;  %v496_v0 = vld [vmem:[#allocation2] sm:$0xff]  ;;  %v498_v1 = vld [vmem:[#allocation2 + $0x8] sm:$0xff]  ;;  %s452_s2 = smov [#allocation10]   ;;  %s255_s15 = sshll.u32 %s590_s4, 4  ;;  %s256_s15 = int_to_ptr.hbm [resolvable:$true] %s255_s15 }
  0x15   :  { %v500_v2 = vld [vmem:[#allocation2 + $0x10] sm:$0xff]  ;;  %v502_v3 = vld [vmem:[#allocation2 + $0x18] sm:$0xff]  ;;  %v504_v4 = vld [vmem:[#allocation2 + $0x20] sm:$0xff]  ;;  %s253_s3 = sshll.u32 %s452_s2, 4  ;;  %s453_s16 = smov [#allocation11]   ;;  %s254_s3 = int_to_ptr.vmem [resolvable:$true] %s253_s3 }
  0x16   :  { %v506_v5 = vld [vmem:[#allocation2 + $0x28] sm:$0xff]  ;;  %v508_v6 = vld [vmem:[#allocation5] sm:$0xff]  ;;  %v512_v8 = vld [vmem:[#allocation5 + $0x10] sm:$0xff]  ;;  %s264_s17 = sshll.u32 %s453_s16, 4  ;;  %s266_s19 = sshll.u32 %s591_s5, 4  ;;  %s265_s17 = int_to_ptr.vmem [resolvable:$true] %s264_s17  ;;  %s267_s19 = int_to_ptr.hbm [resolvable:$true] %s266_s19 }
  0x17   :  { %v510_v7 = vld [vmem:[#allocation5 + $0x8] sm:$0xff]  ;;  %v514_v9 = vld [vmem:[#allocation2 + $0x30] sm:$0xff]  ;;  %v516_v10 = vld [vmem:[#allocation2 + $0x38] sm:$0xff] }
  0x18   :  { %595 = vst [vmem:[#allocation18_spill] sm:$0xff] %v516_v10  ;;  %v518_v11 = vld [vmem:[#allocation5 + $0x18] sm:$0xff]  ;;  %v130_v12 = vld [vmem:[#allocation7] sm:$0xff]  ;;  %v131_v13 = vld [vmem:[#allocation7 + $0x8] sm:$0xff] }
  0x19   :  { %v520_v14 = vld [vmem:[#allocation5 + $0x20] sm:$0xff]  ;;  %v522_v15 = vld [vmem:[#allocation5 + $0x28] sm:$0xff]  ;;  %v132_v16 = vld [vmem:[#allocation7 + $0x10] sm:$0xff]  ;;  %v146_v19 = vsub.f32 %v496_v0, %v130_v12  ;;  %v147_v25 = vsub.f32 %v498_v1, %v131_v13 }
  0x1a   :  { %v133_v17 = vld [vmem:[#allocation7 + $0x18] sm:$0xff]  ;;  %v524_v18 = vld [vmem:[#allocation7 + $0x20] sm:$0xff]  ;;  %v527_v20 = vld [vmem:[#allocation5 + $0x30] sm:$0xff]  ;;  %v148_v26 = vsub.f32 %v500_v2, %v132_v16 }
  0x1b   :  { %v529_v21 = vld [vmem:[#allocation5 + $0x38] sm:$0xff]  ;;  %v531_v22 = vld [vmem:[#allocation7 + $0x28] sm:$0xff]  ;;  %v533_v23 = vld [vmem:[#allocation7 + $0x30] sm:$0xff]  ;;  %v149_v30 = vsub.f32 %v502_v3, %v133_v17  ;;  %v150_v31 = vsub.f32 %v504_v4, %v524_v18  ;;  %v178_v44 = vmul.f32 %v146_v19, %v146_v19  ;;  %v179_v47 = vmul.f32 %v147_v25, %v147_v25 }
  0x1c   :  { %596 = vst [vmem:[#allocation19_spill] sm:$0xff] %v529_v21  ;;  %v535_v24 = vld [vmem:[#allocation7 + $0x38] sm:$0xff]  ;;  %v138_v27 = vld [vmem:[#allocation8] sm:$0xff]  ;;  %v139_v28 = vld [vmem:[#allocation8 + $0x8] sm:$0xff]  ;;  %v151_v35 = vsub.f32 %v506_v5, %v531_v22  ;;  %v152_v41 = vsub.f32 %v514_v9, %v533_v23  ;;  %v180_v48 = vmul.f32 %v148_v26, %v148_v26 }
  0x1d   :  { %597 = vst [vmem:[#allocation20_spill] sm:$0xff] %v535_v24  ;;  %v140_v29 = vld [vmem:[#allocation8 + $0x10] sm:$0xff]  ;;  %v141_v32 = vld [vmem:[#allocation8 + $0x18] sm:$0xff]  ;;  %v142_v33 = vld [vmem:[#allocation8 + $0x20] sm:$0xff]  ;;  %v154_v36 = vsub.f32 %v508_v6, %v138_v27  ;;  %v155_v37 = vsub.f32 %v510_v7, %v139_v28  ;;  %v153_v42 = vsub.f32 %v516_v10, %v535_v24  ;;  %v181_v51 = vmul.f32 %v149_v30, %v149_v30 }
  0x1e   :  { %v143_v34 = vld [vmem:[#allocation8 + $0x28] sm:$0xff]  ;;  %v156_v38 = vsub.f32 %v512_v8, %v140_v29  ;;  %v144_v39 = vld [vmem:[#allocation8 + $0x30] sm:$0xff]  ;;  %v547_v40 = vld [vmem:[#allocation8 + $0x38] sm:$0xff]  ;;  %v157_v43 = vsub.f32 %v518_v11, %v141_v32  ;;  %v158_v45 = vsub.f32 %v520_v14, %v142_v33  ;;  %v182_v56 = vmul.f32 %v150_v31, %v150_v31 }
  0x1f   :  { %v159_v46 = vsub.f32 %v522_v15, %v143_v34  ;;  %v160_v49 = vsub.f32 %v527_v20, %v144_v39  ;;  %v161_v50 = vsub.f32 %v529_v21, %v547_v40  ;;  %v186_v52 = vmul.f32 %v154_v36, %v154_v36 }
  0x20   :  { %v187_v53 = vmul.f32 %v155_v37, %v155_v37  ;;  %v188_v54 = vmul.f32 %v156_v38, %v156_v38  ;;  %v189_v55 = vmul.f32 %v157_v43, %v157_v43  ;;  %v183_v57 = vmul.f32 %v151_v35, %v151_v35 }
  0x21   :  { %v184_v58 = vmul.f32 %v152_v41, %v152_v41  ;;  %v194_v59 = vadd.f32 %v186_v52, %v178_v44  ;;  %v190_v60 = vmul.f32 %v158_v45, %v158_v45  ;;  %v191_v61 = vmul.f32 %v159_v46, %v159_v46 }
  0x22   :  { %v195_v62 = vadd.f32 %v187_v53, %v179_v47  ;;  %v196_v63 = vadd.f32 %v188_v54, %v180_v48  ;;  %v185_v19 = vmul.f32 %v153_v42, %v153_v42  ;;  %v192_v25 = vmul.f32 %v160_v49, %v160_v49 }
  0x23   :  { %v193_v26 = vmul.f32 %v161_v50, %v161_v50  ;;  %v197_v24 = vadd.f32 %v189_v55, %v181_v51  ;;  %v162_v21 = vsub.f32 %v496_v0, %v138_v27  ;;  %v163_v30 = vsub.f32 %v498_v1, %v139_v28 }
  0x24   :  { %v226_v10 = vadd.f32 %v195_v62, %v194_v59  ;;  %v164_v36 = vsub.f32 %v500_v2, %v140_v29  ;;  %v165_v31 = vsub.f32 %v502_v3, %v141_v32  ;;  %v170_v35 = vsub.f32 %v508_v6, %v130_v12  ;;  %v598_v32 = vld [vmem:[#allocation18_spill] sm:$0xff] }
  0x25   :  { %v171_v37 = vsub.f32 %v510_v7, %v131_v13  ;;  %v172_v38 = vsub.f32 %v512_v8, %v132_v16  ;;  %v198_v41 = vadd.f32 %v190_v60, %v182_v56  ;;  %v199_v42 = vadd.f32 %v191_v61, %v183_v57 }
  0x26   :  { %v227_v43 = vadd.f32 %v226_v10, %v196_v63  ;;  %v173_v44 = vsub.f32 %v518_v11, %v133_v17  ;;  %v200_v45 = vadd.f32 %v192_v25, %v184_v58  ;;  %v201_v46 = vadd.f32 %v193_v26, %v185_v19 }
  0x27   :  { %v166_v0 = vsub.f32 %v504_v4, %v142_v33  ;;  %v174_v1 = vsub.f32 %v520_v14, %v524_v18  ;;  %v202_v3 = vmul.f32 %v162_v21, %v162_v21  ;;  %v203_v27 = vmul.f32 %v163_v30, %v163_v30  ;;  %v600_v33 = vld [vmem:[#allocation19_spill] sm:$0xff] }
  0x28   :  { %v228_v2 = vadd.f32 %v227_v43, %v197_v24  ;;  %v204_v6 = vmul.f32 %v164_v36, %v164_v36  ;;  %v167_v7 = vsub.f32 %v506_v5, %v143_v34  ;;  %v175_v8 = vsub.f32 %v522_v15, %v531_v22  ;;  %v599_v22 = vld [vmem:[#allocation20_spill] sm:$0xff] }
  0x29   :  { %v205_v12 = vmul.f32 %v165_v31, %v165_v31  ;;  %v210_v10 = vmul.f32 %v170_v35, %v170_v35  ;;  %v211_v11 = vmul.f32 %v171_v37, %v171_v37  ;;  %v212_v16 = vmul.f32 %v172_v38, %v172_v38 }
  0x2a   :  { %v229_v13 = vadd.f32 %v228_v2, %v198_v41  ;;  %v213_v17 = vmul.f32 %v173_v44, %v173_v44  ;;  %v168_v4 = vsub.f32 %v514_v9, %v144_v39  ;;  %v176_v14 = vsub.f32 %v527_v20, %v533_v23 }
  0x2b   :  { %v206_v18 = vmul.f32 %v166_v0, %v166_v0  ;;  %v214_v21 = vmul.f32 %v174_v1, %v174_v1  ;;  %v218_v28 = vadd.f32 %v210_v10, %v202_v3  ;;  %v219_v29 = vadd.f32 %v211_v11, %v203_v27 }
  0x2c   :  { %v230_v24 = vadd.f32 %v229_v13, %v199_v42  ;;  %v220_v5 = vadd.f32 %v212_v16, %v204_v6  ;;  %v169_v15 = vsub.f32 %v598_v32, %v547_v40  ;;  %v177_v34 = vsub.f32 %v600_v33, %v599_v22 }
  0x2d   :  { %v207_v47 = vmul.f32 %v167_v7, %v167_v7  ;;  %v215_v49 = vmul.f32 %v175_v8, %v175_v8  ;;  %v221_v50 = vadd.f32 %v213_v17, %v205_v12  ;;  %v233_v9 = vadd.f32 %v219_v29, %v218_v28 }
  0x2e   :  { %v231_v48 = vadd.f32 %v230_v24, %v200_v45  ;;  %v208_v39 = vmul.f32 %v168_v4, %v168_v4  ;;  %v216_v23 = vmul.f32 %v176_v14, %v176_v14  ;;  %v222_v51 = vadd.f32 %v214_v21, %v206_v18 }
  0x2f   :  { %v234_v52 = vadd.f32 %v233_v9, %v220_v5  ;;  %v209_v40 = vmul.f32 %v169_v15, %v169_v15  ;;  %v217_v53 = vmul.f32 %v177_v34, %v177_v34  ;;  %v223_v54 = vadd.f32 %v215_v49, %v207_v47 }
  0x30   :  { %v232_v20 = vadd.f32 %v231_v48, %v201_v46  ;;  %v224_v56 = vadd.f32 %v216_v23, %v208_v39 }
  0x31   :  { %v235_v55 = vadd.f32 %v234_v52, %v221_v50  ;;  %v225_v58 = vadd.f32 %v217_v53, %v209_v40 }
  0x32   :  { %244 = vst [vmem:[#allocation10] sm:$0xff] %v232_v20 }
  0x33   :  { %v236_v57 = vadd.f32 %v235_v55, %v222_v51  ;;  %258 = dma.vmem_to_hbm [thread:$0]  %s254_s3, 128, %s256_s15, [#allocation4]  }
  0x35   :  { %v237_v59 = vadd.f32 %v236_v57, %v223_v54 }
  0x37   :  { %v238_v60 = vadd.f32 %v237_v59, %v224_v56 }
  0x39   :  { %v239_v61 = vadd.f32 %v238_v60, %v225_v58 }
  0x3b   :  { %247 = vst [vmem:[#allocation11] sm:$0xff] %v239_v61 }
  0x3c   :  { %269 = dma.vmem_to_hbm [thread:$0]  %s265_s17, 128, %s267_s19, [#allocation12]  }
  0x3d   :  { %442 = dma.done.wait [#allocation4], 128  }
  0x3e   :  { %443 = vsyncadd [#allocation4], 4294967168 }
  0x3f   :  { %444 = dma.done.wait [#allocation12], 128  }
  0x40   :  { %445 = vsyncadd [#allocation12], 4294967168 }
  0x41   :  { %278 = vsyncpa [#allocation3], 1 }
  0x42   :  { %279 = vsyncpa [#allocation6], 1 }
  0x43   :  { %280 = vsyncpa [#allocation9], 1 }
  0x44   :  { %281 = vsyncpa [#allocation4], 1 }
  0x45   :  { %282 = vsyncpa [#allocation12], 1 }

</bundles_post_ra>
